<compile_context>
chip_gen: v5e
topology: v5e:2x2
jax: 0.10.0
libtpu: 0.0.40
codegen_flags: <defaults>
</compile_context>

<pallas_src>
import functools

import jax
import jax.numpy as jnp
import numpy as np
from jax import lax
from jax.experimental import pallas as pl
from jax.experimental.pallas import tpu as pltpu

EPS = 1e-5
LANES = 128


def _round_up(x, m):
    return (x + m - 1) // m * m


# ----------------------------------------------------------------------------
# One-time parameter folding (review: fold at param-load time, not per step).
# The 3x3 conv, 3x1 conv, 1x3 conv and their eval-mode BatchNorms collapse
# into a single 3x3 kernel, stored tap-major as (9, Cout, Cin), plus one bias.
# ----------------------------------------------------------------------------
def _fuse_weights_and_bias(params):
    w_sq = params["w_sq"].astype(jnp.float32)    # (Cout, Cin, 3, 3)
    w_ver = params["w_ver"].astype(jnp.float32)  # (Cout, Cin, 3, 1)
    w_hor = params["w_hor"].astype(jnp.float32)  # (Cout, Cin, 1, 3)
    cout, cin = w_sq.shape[:2]

    def bn_affine(p):
        inv = p["gamma"].astype(jnp.float32) / jnp.sqrt(
            p["var"].astype(jnp.float32) + EPS)
        return inv, p["beta"].astype(jnp.float32) - p["mean"].astype(jnp.float32) * inv

    s_sq, b_sq = bn_affine(params["bn_sq"])
    s_ver, b_ver = bn_affine(params["bn_ver"])
    s_hor, b_hor = bn_affine(params["bn_hor"])

    # BN scales folded into the conv weights; ver adds into the center column
    # (dx=1), hor adds into the center row (dy=1) of the fused 3x3 kernel.
    wf = w_sq * s_sq[:, None, None, None]
    wf = wf.at[:, :, :, 1].add(w_ver[:, :, :, 0] * s_ver[:, None, None])
    wf = wf.at[:, :, 1, :].add(w_hor[:, :, 0, :] * s_hor[:, None, None])

    # (Cout, Cin, 3, 3) -> (3, 3, Cout, Cin) -> (9, Cout, Cin); tap t = dy*3+dx.
    w9 = jnp.transpose(wf, (2, 3, 0, 1)).reshape(9, cout, cin)
    bias = (b_sq + b_ver + b_hor).reshape(cout, 1)
    return w9, bias


def prepare_acblock(params, compute_dtype=jnp.bfloat16):
    """Fold + cast once per checkpoint; returns (w9, bias) for acblock_forward."""
    w9, bias = _fuse_weights_and_bias(params)
    return w9.astype(compute_dtype), bias            # bias stays f32


# ----------------------------------------------------------------------------
# Pallas kernel: one image per grid step.  The 9 taps are lane-shifted views
# of the padded, flattened image; each tap does a small (Cout,Cin)x(Cin,Pout)
# MXU dot, accumulated in f32, then the fused bias is added.
# ----------------------------------------------------------------------------
def _acblock_kernel(x_ref, w_ref, b_ref, o_ref, *, tap_starts, pout):
    # x_ref: (1, Cin, Wtot)   padded + flattened image slab (pixels on lanes)
    # w_ref: (9, Cout, Cin)   fused weight, resident across the grid
    # b_ref: (Cout, 1)        fused bias (f32), resident
    # o_ref: (1, Cout, Pout)  lane-dense f32 output slab
    acc = None
    for t, s in enumerate(tap_starts):               # static 9-iteration loop
        x_tap = x_ref[0, :, pl.ds(s, pout)]          # (Cin, Pout) shifted tap view
        part = jnp.dot(w_ref[t], x_tap, preferred_element_type=jnp.float32)
        acc = part if acc is None else acc + part
    o_ref[0] = (acc + b_ref[...]).astype(o_ref.dtype)


# ----------------------------------------------------------------------------
# VMEM accounting (lane/sublane-padded, per review) + per-generation cap.
# ----------------------------------------------------------------------------
def _vmem_tile_bytes(rows, cols, dtype):
    it = jnp.dtype(dtype).itemsize
    sublanes = max(8, 32 // it)          # 8 for f32, 16 for bf16 (sublane packing)
    return _round_up(rows, sublanes) * _round_up(cols, LANES) * it


def _vmem_cap_bytes():
    try:
        cap = getattr(pltpu.get_tpu_info(), "vmem_capacity_bytes", None)
        if cap:
            return int(cap)
    except Exception:
        pass
    return 64 * 2 ** 20                  # conservative (v7x-sized) fallback


# ----------------------------------------------------------------------------
# Forward wrapper: spatial zero-pad + flatten (cheap), tiled pallas_call over
# images, then a ~1.3x border crop that lands directly in NCHW (no transpose).
# ----------------------------------------------------------------------------
@jax.jit
def acblock_forward(x_nchw, w9, bias):
    N, Cin, H, W = x_nchw.shape
    Cout = w9.shape[1]
    cdt = w9.dtype
    Hp, Wp = H + 2, W + 2
    P = Hp * Wp                                   # padded flat pixels per image
    Pout = _round_up(P, LANES)                    # lane-dense kernel output width
    Lpad = Wp + 1                                 # left halo so every tap start >= 0
    Wtot = _round_up(2 * Wp + 2 + Pout, LANES)    # slab width (lane-dense loads)
    # Tap (dy,dx) reads xflat[p + (dy-1)*Wp + (dx-1)]  ->  slice start dy*Wp+dx
    # (order matches the (9, Cout, Cin) weight layout, t = dy*3 + dx).
    tap_starts = tuple(dy * Wp + dx for dy in range(3) for dx in range(3))

    x = x_nchw.astype(cdt)
    xpad = jnp.pad(x, ((0, 0), (0, 0), (1, 1), (1, 1)))            # conv zero pad
    xw = jnp.pad(xpad.reshape(N, Cin, P),
                 ((0, 0), (0, 0), (Lpad, Wtot - Lpad - P)))        # flat halo pad

    est = (2 * _vmem_tile_bytes(Cin, Wtot, cdt)                    # input slab x2
           + 2 * _vmem_tile_bytes(Cout, Pout, jnp.float32)         # output x2
           + 2 * 9 * _vmem_tile_bytes(Cout, Cin, cdt)              # weights x2
           + 2 * _vmem_tile_bytes(Cout, 1, jnp.float32)            # bias x2
           + 2 * _vmem_tile_bytes(Cin, Pout, cdt)                  # tap temporaries
           + 2 * _vmem_tile_bytes(Cout, Pout, jnp.float32))        # acc temporaries
    vmem_limit = int(min(int(0.625 * _vmem_cap_bytes()),           # ~40MiB v7x, ~80MiB v5e/v6e
                         max(16 * 2 ** 20, 2 * est)))

    kernel = functools.partial(_acblock_kernel, tap_starts=tap_starts, pout=Pout)
    out = pl.pallas_call(
        kernel,
        out_shape=jax.ShapeDtypeStruct((N, Cout, Pout), jnp.float32),
        grid=(N,),
        in_specs=[
            pl.BlockSpec((1, Cin, Wtot), lambda n: (n, 0, 0)),     # image slab (pipelined)
            # TODO(synk): pipeline_mode=pl.Buffered(1) on the two resident
            # operands would drop their second VMEM buffer; only matters for
            # very large Cin*Cout, so it is left at the default here.
            pl.BlockSpec((9, Cout, Cin), lambda n: (0, 0, 0)),     # fused weight (resident)
            pl.BlockSpec((Cout, 1), lambda n: (0, 0)),             # fused bias (resident)
        ],
        out_specs=pl.BlockSpec((1, Cout, Pout), lambda n: (n, 0, 0)),
        compiler_params=pltpu.CompilerParams(
            dimension_semantics=("parallel",),                     # v7x: one image per core
            vmem_limit_bytes=vmem_limit),
    )(xw, w9, bias)

    # Border columns/rows of the padded frame (and the Pout-P tail) hold
    # garbage-but-unused values; this crop removes them and is already NCHW.
    return out[:, :, :P].reshape(N, Cout, Hp, Wp)[:, :, 1:Hp - 1, 1:Wp - 1]


# ----------------------------------------------------------------------------
# Pure-JAX reference (lax.conv, f32) for correctness checking.
# ----------------------------------------------------------------------------
def acblock_reference(x_nchw, params):
    x = x_nchw.astype(jnp.float32)

    def conv(w, pad):
        dn = lax.conv_dimension_numbers(x.shape, w.shape,
                                        ("NCHW", "OIHW", "NCHW"))
        return lax.conv_general_dilated(x, w.astype(jnp.float32), (1, 1), pad,
                                        dimension_numbers=dn)

    def bn(y, p):
        inv = p["gamma"] / jnp.sqrt(p["var"] + EPS)
        return (y * inv[None, :, None, None]
                + (p["beta"] - p["mean"] * inv)[None, :, None, None])

    sq = bn(conv(params["w_sq"], ((1, 1), (1, 1))), params["bn_sq"])
    ver = bn(conv(params["w_ver"], ((1, 1), (0, 0))), params["bn_ver"])
    hor = bn(conv(params["w_hor"], ((0, 0), (1, 1))), params["bn_hor"])
    return sq + ver + hor


# ----------------------------------------------------------------------------
# Deterministic parameter initialization (ACBlock(in=4, out=8, k=3, padding=1,
# deploy=False)).
# ----------------------------------------------------------------------------
def init_params(key, cin, cout):
    keys = jax.random.split(key, 15)

    def bn_params(k0, k1, k2, k3):
        return dict(
            gamma=jax.random.uniform(k0, (cout,), minval=0.5, maxval=1.5),
            beta=jax.random.normal(k1, (cout,)) * 0.1,
            mean=jax.random.normal(k2, (cout,)) * 0.1,
            var=jax.random.uniform(k3, (cout,), minval=0.5, maxval=1.5),
        )

    return dict(
        w_sq=jax.random.normal(keys[0], (cout, cin, 3, 3)) * 0.1,
        w_ver=jax.random.normal(keys[1], (cout, cin, 3, 1)) * 0.1,
        w_hor=jax.random.normal(keys[2], (cout, cin, 1, 3)) * 0.1,
        bn_sq=bn_params(*keys[3:7]),
        bn_ver=bn_params(*keys[7:11]),
        bn_hor=bn_params(*keys[11:15]),
    )


if __name__ == "__main__":
    key = jax.random.PRNGKey(0)
    k_x, k_p = jax.random.split(key)

    N, Cin, H, W = 2, 4, 16, 16
    Cout = 8

    x = jax.random.normal(k_x, (N, Cin, H, W), dtype=jnp.float32)
    params = init_params(k_p, Cin, Cout)

    ref = jax.block_until_ready(acblock_reference(x, params))

    # Performance path: bf16 MXU operands, f32 accumulation and f32 output.
    w9_bf16, bias = prepare_acblock(params, jnp.bfloat16)   # folded once per checkpoint
    out_bf16 = jax.block_until_ready(acblock_forward(x, w9_bf16, bias))
    assert out_bf16.shape == (N, Cout, H, W), out_bf16.shape
    np.testing.assert_allclose(np.asarray(out_bf16), np.asarray(ref),
                               rtol=5e-2, atol=5e-2)

    # f32 path proves the conv/BN fusion algebra exactly (tight tolerance).
    w9_f32, bias_f32 = prepare_acblock(params, jnp.float32)
    out_f32 = jax.block_until_ready(acblock_forward(x, w9_f32, bias_f32))
    np.testing.assert_allclose(np.asarray(out_f32), np.asarray(ref),
                               rtol=1e-4, atol=1e-4)

    print("KERNEL_OK")
</pallas_src>

<mosaic_0001>
module attributes {stable_mosaic.version = 11 : i64} {
  func.func @_acblock_kernel(%arg0: i32, %arg1: memref<1x4x512xbf16, #tpu.memory_space<vmem>>, %arg2: memref<9x8x4xbf16, #tpu.memory_space<vmem>>, %arg3: memref<8x1xf32, #tpu.memory_space<vmem>>, %arg4: memref<1x8x384xf32, #tpu.memory_space<vmem>>) attributes {dimension_semantics = [#tpu.dimension_semantics<parallel>], iteration_bounds = array<i64: 2>, scalar_prefetch = 0 : i64, scratch_operands = 0 : i64, tpu.core_type = #tpu.core_type<tc>, window_params = [{transform_indices = @transform_0, window_bounds = array<i64: 1, 4, 512>}, {pipeline_mode = #tpu.pipeline_mode<synchronous>, transform_indices = @transform_1, window_bounds = array<i64: 9, 8, 4>}, {pipeline_mode = #tpu.pipeline_mode<synchronous>, transform_indices = @transform_2, window_bounds = array<i64: 8, 1>}, {transform_indices = @transform_3, window_bounds = array<i64: 1, 8, 384>}]} {
    %c0 = arith.constant 0 : index
    %c0_0 = arith.constant 0 : index
    %c0_1 = arith.constant 0 : index
    %0 = vector.load %arg1[%c0, %c0_0, %c0_1] : memref<1x4x512xbf16, #tpu.memory_space<vmem>>, vector<1x4x384xbf16>
    %1 = vector.shape_cast %0 : vector<1x4x384xbf16> to vector<4x384xbf16>
    %c0_2 = arith.constant 0 : index
    %c0_3 = arith.constant 0 : index
    %c0_4 = arith.constant 0 : index
    %2 = vector.load %arg2[%c0_2, %c0_3, %c0_4] : memref<9x8x4xbf16, #tpu.memory_space<vmem>>, vector<1x8x4xbf16>
    %3 = vector.shape_cast %2 : vector<1x8x4xbf16> to vector<8x4xbf16>
    %cst = arith.constant dense<0.000000e+00> : vector<8x384xf32>
    %4 = tpu.matmul %3, %1, %cst {dimension_numbers = #tpu.dot_dimension_numbers<[1], [0], [0], [1], [0, 0, 1, 1], [], []>} : vector<8x4xbf16>, vector<4x384xbf16>, vector<8x384xf32> -> vector<8x384xf32>
    %c0_5 = arith.constant 0 : index
    %c0_6 = arith.constant 0 : index
    %c1 = arith.constant 1 : index
    %5 = vector.load %arg1[%c0_5, %c0_6, %c1] : memref<1x4x512xbf16, #tpu.memory_space<vmem>>, vector<1x4x384xbf16>
    %6 = vector.shape_cast %5 : vector<1x4x384xbf16> to vector<4x384xbf16>
    %c1_7 = arith.constant 1 : index
    %c0_8 = arith.constant 0 : index
    %c0_9 = arith.constant 0 : index
    %7 = vector.load %arg2[%c1_7, %c0_8, %c0_9] : memref<9x8x4xbf16, #tpu.memory_space<vmem>>, vector<1x8x4xbf16>
    %8 = vector.shape_cast %7 : vector<1x8x4xbf16> to vector<8x4xbf16>
    %cst_10 = arith.constant dense<0.000000e+00> : vector<8x384xf32>
    %9 = tpu.matmul %8, %6, %cst_10 {dimension_numbers = #tpu.dot_dimension_numbers<[1], [0], [0], [1], [0, 0, 1, 1], [], []>} : vector<8x4xbf16>, vector<4x384xbf16>, vector<8x384xf32> -> vector<8x384xf32>
    %10 = arith.addf %4, %9 : vector<8x384xf32>
    %c0_11 = arith.constant 0 : index
    %c0_12 = arith.constant 0 : index
    %c2 = arith.constant 2 : index
    %11 = vector.load %arg1[%c0_11, %c0_12, %c2] : memref<1x4x512xbf16, #tpu.memory_space<vmem>>, vector<1x4x384xbf16>
    %12 = vector.shape_cast %11 : vector<1x4x384xbf16> to vector<4x384xbf16>
    %c2_13 = arith.constant 2 : index
    %c0_14 = arith.constant 0 : index
    %c0_15 = arith.constant 0 : index
    %13 = vector.load %arg2[%c2_13, %c0_14, %c0_15] : memref<9x8x4xbf16, #tpu.memory_space<vmem>>, vector<1x8x4xbf16>
    %14 = vector.shape_cast %13 : vector<1x8x4xbf16> to vector<8x4xbf16>
    %cst_16 = arith.constant dense<0.000000e+00> : vector<8x384xf32>
    %15 = tpu.matmul %14, %12, %cst_16 {dimension_numbers = #tpu.dot_dimension_numbers<[1], [0], [0], [1], [0, 0, 1, 1], [], []>} : vector<8x4xbf16>, vector<4x384xbf16>, vector<8x384xf32> -> vector<8x384xf32>
    %16 = arith.addf %10, %15 : vector<8x384xf32>
    %c0_17 = arith.constant 0 : index
    %c0_18 = arith.constant 0 : index
    %c18 = arith.constant 18 : index
    %17 = vector.load %arg1[%c0_17, %c0_18, %c18] : memref<1x4x512xbf16, #tpu.memory_space<vmem>>, vector<1x4x384xbf16>
    %18 = vector.shape_cast %17 : vector<1x4x384xbf16> to vector<4x384xbf16>
    %c3 = arith.constant 3 : index
    %c0_19 = arith.constant 0 : index
    %c0_20 = arith.constant 0 : index
    %19 = vector.load %arg2[%c3, %c0_19, %c0_20] : memref<9x8x4xbf16, #tpu.memory_space<vmem>>, vector<1x8x4xbf16>
    %20 = vector.shape_cast %19 : vector<1x8x4xbf16> to vector<8x4xbf16>
    %cst_21 = arith.constant dense<0.000000e+00> : vector<8x384xf32>
    %21 = tpu.matmul %20, %18, %cst_21 {dimension_numbers = #tpu.dot_dimension_numbers<[1], [0], [0], [1], [0, 0, 1, 1], [], []>} : vector<8x4xbf16>, vector<4x384xbf16>, vector<8x384xf32> -> vector<8x384xf32>
    %22 = arith.addf %16, %21 : vector<8x384xf32>
    %c0_22 = arith.constant 0 : index
    %c0_23 = arith.constant 0 : index
    %c19 = arith.constant 19 : index
    %23 = vector.load %arg1[%c0_22, %c0_23, %c19] : memref<1x4x512xbf16, #tpu.memory_space<vmem>>, vector<1x4x384xbf16>
    %24 = vector.shape_cast %23 : vector<1x4x384xbf16> to vector<4x384xbf16>
    %c4 = arith.constant 4 : index
    %c0_24 = arith.constant 0 : index
    %c0_25 = arith.constant 0 : index
    %25 = vector.load %arg2[%c4, %c0_24, %c0_25] : memref<9x8x4xbf16, #tpu.memory_space<vmem>>, vector<1x8x4xbf16>
    %26 = vector.shape_cast %25 : vector<1x8x4xbf16> to vector<8x4xbf16>
    %cst_26 = arith.constant dense<0.000000e+00> : vector<8x384xf32>
    %27 = tpu.matmul %26, %24, %cst_26 {dimension_numbers = #tpu.dot_dimension_numbers<[1], [0], [0], [1], [0, 0, 1, 1], [], []>} : vector<8x4xbf16>, vector<4x384xbf16>, vector<8x384xf32> -> vector<8x384xf32>
    %28 = arith.addf %22, %27 : vector<8x384xf32>
    %c0_27 = arith.constant 0 : index
    %c0_28 = arith.constant 0 : index
    %c20 = arith.constant 20 : index
    %29 = vector.load %arg1[%c0_27, %c0_28, %c20] : memref<1x4x512xbf16, #tpu.memory_space<vmem>>, vector<1x4x384xbf16>
    %30 = vector.shape_cast %29 : vector<1x4x384xbf16> to vector<4x384xbf16>
    %c5 = arith.constant 5 : index
    %c0_29 = arith.constant 0 : index
    %c0_30 = arith.constant 0 : index
    %31 = vector.load %arg2[%c5, %c0_29, %c0_30] : memref<9x8x4xbf16, #tpu.memory_space<vmem>>, vector<1x8x4xbf16>
    %32 = vector.shape_cast %31 : vector<1x8x4xbf16> to vector<8x4xbf16>
    %cst_31 = arith.constant dense<0.000000e+00> : vector<8x384xf32>
    %33 = tpu.matmul %32, %30, %cst_31 {dimension_numbers = #tpu.dot_dimension_numbers<[1], [0], [0], [1], [0, 0, 1, 1], [], []>} : vector<8x4xbf16>, vector<4x384xbf16>, vector<8x384xf32> -> vector<8x384xf32>
    %34 = arith.addf %28, %33 : vector<8x384xf32>
    %c0_32 = arith.constant 0 : index
    %c0_33 = arith.constant 0 : index
    %c36 = arith.constant 36 : index
    %35 = vector.load %arg1[%c0_32, %c0_33, %c36] : memref<1x4x512xbf16, #tpu.memory_space<vmem>>, vector<1x4x384xbf16>
    %36 = vector.shape_cast %35 : vector<1x4x384xbf16> to vector<4x384xbf16>
    %c6 = arith.constant 6 : index
    %c0_34 = arith.constant 0 : index
    %c0_35 = arith.constant 0 : index
    %37 = vector.load %arg2[%c6, %c0_34, %c0_35] : memref<9x8x4xbf16, #tpu.memory_space<vmem>>, vector<1x8x4xbf16>
    %38 = vector.shape_cast %37 : vector<1x8x4xbf16> to vector<8x4xbf16>
    %cst_36 = arith.constant dense<0.000000e+00> : vector<8x384xf32>
    %39 = tpu.matmul %38, %36, %cst_36 {dimension_numbers = #tpu.dot_dimension_numbers<[1], [0], [0], [1], [0, 0, 1, 1], [], []>} : vector<8x4xbf16>, vector<4x384xbf16>, vector<8x384xf32> -> vector<8x384xf32>
    %40 = arith.addf %34, %39 : vector<8x384xf32>
    %c0_37 = arith.constant 0 : index
    %c0_38 = arith.constant 0 : index
    %c37 = arith.constant 37 : index
    %41 = vector.load %arg1[%c0_37, %c0_38, %c37] : memref<1x4x512xbf16, #tpu.memory_space<vmem>>, vector<1x4x384xbf16>
    %42 = vector.shape_cast %41 : vector<1x4x384xbf16> to vector<4x384xbf16>
    %c7 = arith.constant 7 : index
    %c0_39 = arith.constant 0 : index
    %c0_40 = arith.constant 0 : index
    %43 = vector.load %arg2[%c7, %c0_39, %c0_40] : memref<9x8x4xbf16, #tpu.memory_space<vmem>>, vector<1x8x4xbf16>
    %44 = vector.shape_cast %43 : vector<1x8x4xbf16> to vector<8x4xbf16>
    %cst_41 = arith.constant dense<0.000000e+00> : vector<8x384xf32>
    %45 = tpu.matmul %44, %42, %cst_41 {dimension_numbers = #tpu.dot_dimension_numbers<[1], [0], [0], [1], [0, 0, 1, 1], [], []>} : vector<8x4xbf16>, vector<4x384xbf16>, vector<8x384xf32> -> vector<8x384xf32>
    %46 = arith.addf %40, %45 : vector<8x384xf32>
    %c0_42 = arith.constant 0 : index
    %c0_43 = arith.constant 0 : index
    %c38 = arith.constant 38 : index
    %47 = vector.load %arg1[%c0_42, %c0_43, %c38] : memref<1x4x512xbf16, #tpu.memory_space<vmem>>, vector<1x4x384xbf16>
    %48 = vector.shape_cast %47 : vector<1x4x384xbf16> to vector<4x384xbf16>
    %c8 = arith.constant 8 : index
    %c0_44 = arith.constant 0 : index
    %c0_45 = arith.constant 0 : index
    %49 = vector.load %arg2[%c8, %c0_44, %c0_45] : memref<9x8x4xbf16, #tpu.memory_space<vmem>>, vector<1x8x4xbf16>
    %50 = vector.shape_cast %49 : vector<1x8x4xbf16> to vector<8x4xbf16>
    %cst_46 = arith.constant dense<0.000000e+00> : vector<8x384xf32>
    %51 = tpu.matmul %50, %48, %cst_46 {dimension_numbers = #tpu.dot_dimension_numbers<[1], [0], [0], [1], [0, 0, 1, 1], [], []>} : vector<8x4xbf16>, vector<4x384xbf16>, vector<8x384xf32> -> vector<8x384xf32>
    %52 = arith.addf %46, %51 : vector<8x384xf32>
    %c0_47 = arith.constant 0 : index
    %c0_48 = arith.constant 0 : index
    %53 = vector.load %arg3[%c0_47, %c0_48] : memref<8x1xf32, #tpu.memory_space<vmem>>, vector<8x1xf32>
    %54 = vector.broadcast %53 : vector<8x1xf32> to vector<8x384xf32>
    %55 = arith.addf %52, %54 : vector<8x384xf32>
    %c0_49 = arith.constant 0 : index
    %c0_50 = arith.constant 0 : index
    %c0_51 = arith.constant 0 : index
    %56 = vector.load %arg4[%c0_49, %c0_50, %c0_51] : memref<1x8x384xf32, #tpu.memory_space<vmem>>, vector<1x8x384xf32>
    %57 = vector.shape_cast %56 : vector<1x8x384xf32> to vector<8x384xf32>
    %58 = vector.shape_cast %55 : vector<8x384xf32> to vector<1x8x384xf32>
    tpu.vector_store %arg4[%c0_49, %c0_50, %c0_51], %58 {strides = array<i32>} : memref<1x8x384xf32, #tpu.memory_space<vmem>>, vector<1x8x384xf32>,
    return
  }
  func.func @transform_0(%arg0: i32) -> (i32, i32, i32) {
    %c0_i32 = arith.constant 0 : i32
    %c0_i32_0 = arith.constant 0 : i32
    %c0_i32_1 = arith.constant 0 : i32
    return %arg0, %c0_i32, %c0_i32_0 : i32, i32, i32
  }
  func.func @transform_1(%arg0: i32) -> (i32, i32, i32) {
    %c0_i32 = arith.constant 0 : i32
    %c0_i32_0 = arith.constant 0 : i32
    %c0_i32_1 = arith.constant 0 : i32
    %c0_i32_2 = arith.constant 0 : i32
    return %c0_i32, %c0_i32_0, %c0_i32_1 : i32, i32, i32
  }
  func.func @transform_2(%arg0: i32) -> (i32, i32) {
    %c0_i32 = arith.constant 0 : i32
    %c0_i32_0 = arith.constant 0 : i32
    %c0_i32_1 = arith.constant 0 : i32
    return %c0_i32, %c0_i32_0 : i32, i32
  }
  func.func @transform_3(%arg0: i32) -> (i32, i32, i32) {
    %c0_i32 = arith.constant 0 : i32
    %c0_i32_0 = arith.constant 0 : i32
    %c0_i32_1 = arith.constant 0 : i32
    return %arg0, %c0_i32, %c0_i32_0 : i32, i32, i32
  }
}

</mosaic_0001>

<bundles_post_ra>
// kernel: acblock_forward.1
= control target key start
LH: loop header
LB: loop body
LE: loop exit
PB: predicated region body
PF: predicated region fallthrough
CT: control target
= control target key end

     0   :  { %s1028_s12 = smov 0   ;;  %s1167_s0 = inlined_call_operand.vmem [shape: bf16[2,4,512], index: 0, kind: input, shape index: {}]   ;;  %s1168_s1 = inlined_call_operand.vmem [shape: bf16[9,8,4], index: 1, kind: input, shape index: {}]   ;;  %s1169_s2 = inlined_call_operand.vmem [shape: f32[8,1], index: 2, kind: input, shape index: {}]   ;;  %s1170_s3 = inlined_call_operand.vmem [shape: f32[2,8,384], index: 3, kind: output, shape index: {}]  }
   0x1 LB: > { %s925_s13 = sadd.s32 4294967295, %s997_s12   ;;  %p929_p0 = scmp.ge.s32.totalorder %s997_s12, 1  ;;  %s997_s12 = sphi %s1028_s12, %s13_s12  }
   0x2   : > { %p137_p1 = scmp.lt.s32.totalorder %s997_s12, 3 }
   0x4   : > { %p138_p2 = pnand %p929_p0, %p137_p1 }
   0x5   : > { %p161_p3 = scmp.lt.s32.totalorder (!%p138_p2), %s925_s13, 1  ;;  %s999_s18 = smov (!%p138_p2), 127  }
   0x6   : > { %141 = sbr.rel (%p138_p2) target bundleno = 390 (0x186), region = 32  ;;  %s1000_s19 = smov (!%p138_p2), 126  }
   0x7   : > { %s1001_s20 = smov (!%p138_p2), 110   ;;  %s1002_s21 = smov (!%p138_p2), 109  }
   0x8   : > { %s1003_s22 = smov (!%p138_p2), 108   ;;  %s1004_s23 = smov (!%p138_p2), 92  }
   0x9   : > { %s1005_s24 = smov (!%p138_p2), 91   ;;  %s1006_s25 = smov (!%p138_p2), 90  }
   0xb   : > { %s1172_s13 = smov (!%p161_p3, %s925_s13), 1  ;;  %vm203_vm0 = vcmask 1041408   ;;  %v173_v38 = vld [vmem:[%s1168_s1] sm:$0xf]  ;;  %vm199_vm1 = vcmask 31744   ;;  %vm326_vm2 = vcmask 1031168  }
   0xc   : > { %s970_s14 = sshll.u32 %s1172_s13, 3  ;;  %vm195_vm3 = vcmask 1039360   ;;  %v933_v55 = vld [vmem:[%s1168_s1 + $0x4] sm:$0xf]  ;;  %vm405_vm4 = vcmask 900096   ;;  %vm484_vm5 = vcmask 891904  }
   0xd   : > { %s165_s17 = scalar_lea.vmem %s1167_s0, %s970_s14  ;;  %v940_v62 = vld [vmem:[%s1168_s1 + $0x8] sm:$0xf]  ;;  %vm563_vm6 = vcmask 883712   ;;  %vm642_vm7 = vcmask 752640   ;;  %vm721_vm8 = vcmask 744448   ;;  %vm800_vm9 = vcmask 736256  }
   0xe   : > { %v1042_v0 = vld [vmem:[%s165_s17] sm:$0xff] }
   0xf   : > { %178 = vst [vmem:[#allocation1] ss:$4 sm:$0xff] %v1042_v0  ;;  %v172_v1 = vld [vmem:[%s165_s17] sm:$0x3f] }
  0x16   : > { %v183_v2 = vld.sshfl [vmem:[#allocation1 + $0x10] sm:$0xff pattern:$0x73625140]  ;;  %v179_v3 = vld.sshfl [vmem:[#allocation1] sm:$0xff pattern:$0x73625140] }
  0x17   : > { %191 = vrot.lane.b32.xlu0 %v183_v2, %s999_s18  ;;  %187 = vrot.lane.b32.xlu1 %v179_v3, %s999_s18  ;;  %v185_v4 = vld.sshfl [vmem:[#allocation1 + $0x18] sm:$0xff pattern:$0x73625140]  ;;  %v181_v5 = vld.sshfl [vmem:[#allocation1 + $0x8] sm:$0xff pattern:$0x73625140] }
  0x18   : > { %253 = vst [vmem:[#allocation1] ss:$4 sm:$0xff] %v172_v1 }
  0x1f   : > { %193 = vrot.lane.b32.xlu0 %v185_v4, %s999_s18  ;;  %189 = vrot.lane.b32.xlu1 %v181_v5, %s999_s18  ;;  %v1045_v6 = vld.sshfl [vmem:[#allocation1] sm:$0xff pattern:$0x73625140]  ;;  %v1047_v7 = vld.sshfl [vmem:[#allocation1 + $0x8] sm:$0xff pattern:$0x73625140] }
  0x20   : > { %v1049_v8 = vld.sshfl [vmem:[#allocation1 + $0x10] sm:$0xff pattern:$0x73625140]  ;;  %v260_v35 = vsel %vm203_vm0, %v1045_v6, 0  ;;  %v262_v46 = vsel %vm203_vm0, %v1047_v7, 0 }
  0x21   : > { %309 = vst [vmem:[#allocation1] ss:$4 sm:$0xff] %v1042_v0  ;;  %273 = vmatpush.bf16.msra.mxu3 %v260_v35  ;;  %v264_v50 = vsel %vm203_vm0, %v1049_v8, 0 }
  0x24   : > { %937 = vmatmul.msk.bf16.vlgmr.msra.gmra.mxu3 %vm199_vm1, %v173_v38 }
  0x28   : > { %v312_v9 = vld.sshfl [vmem:[#allocation1 + $0x8] sm:$0xff pattern:$0x73625140]  ;;  %v316_v10 = vld.sshfl [vmem:[#allocation1 + $0x18] sm:$0xff pattern:$0x73625140] }
  0x29   : > { %v314_v11 = vld.sshfl [vmem:[#allocation1 + $0x10] sm:$0xff pattern:$0x73625140]  ;;  %v310_v12 = vld.sshfl [vmem:[#allocation1] sm:$0xff pattern:$0x73625140] }
  0x2a   : > { %322 = vrot.lane.b32.xlu0 %v314_v11, %s1000_s19  ;;  %318 = vrot.lane.b32.xlu2 %v310_v12, %s1000_s19  ;;  %388 = vst [vmem:[#allocation1] ss:$4 sm:$0xff] %v1042_v0  ;;  %v944_v12 = vld [vmem:[%s1168_s1 + $0xc] sm:$0xf] }
  0x31   : > { %v391_v13 = vld.sshfl [vmem:[#allocation1 + $0x8] sm:$0xff pattern:$0x73625140]  ;;  %v393_v14 = vld.sshfl [vmem:[#allocation1 + $0x10] sm:$0xff pattern:$0x73625140] }
  0x32   : > { %v395_v15 = vld.sshfl [vmem:[#allocation1 + $0x18] sm:$0xff pattern:$0x73625140]  ;;  %399 = vrot.lane.b32.xlu1 %v391_v13, %s1001_s20  ;;  %324 = vrot.lane.b32.xlu0 %v316_v10, %s1000_s19  ;;  %v389_v16 = vld.sshfl [vmem:[#allocation1] sm:$0xff pattern:$0x73625140] }
  0x33   : > { %320 = vrot.lane.b32.xlu2 %v312_v9, %s1000_s19  ;;  %467 = vst [vmem:[#allocation1] ss:$4 sm:$0xff] %v1042_v0 }
  0x3a   : > { %397 = vrot.lane.b32.xlu1 %v389_v16, %s1001_s20  ;;  %v472_v17 = vld.sshfl [vmem:[#allocation1 + $0x10] sm:$0xff pattern:$0x73625140]  ;;  %v468_v18 = vld.sshfl [vmem:[#allocation1] sm:$0xff pattern:$0x73625140] }
  0x3b   : > { %480 = vrot.lane.b32.xlu0 %v472_v17, %s1002_s21  ;;  %v474_v19 = vld.sshfl [vmem:[#allocation1 + $0x18] sm:$0xff pattern:$0x73625140]  ;;  %v470_v20 = vld.sshfl [vmem:[#allocation1 + $0x8] sm:$0xff pattern:$0x73625140]  ;;  %401 = vrot.lane.b32.xlu2 %v393_v14, %s1001_s20 }
  0x3c   : > { %546 = vst [vmem:[#allocation1] ss:$4 sm:$0xff] %v1042_v0 }
  0x42   : > { %482 = vrot.lane.b32.xlu1 %v474_v19, %s1002_s21 }
  0x43   : > { %478 = vrot.lane.b32.xlu0 %v470_v20, %s1002_s21  ;;  %v549_v21 = vld.sshfl [vmem:[#allocation1 + $0x8] sm:$0xff pattern:$0x73625140]  ;;  %v551_v22 = vld.sshfl [vmem:[#allocation1 + $0x10] sm:$0xff pattern:$0x73625140]  ;;  %403 = vrot.lane.b32.xlu2 %v395_v15, %s1001_s20 }
  0x44   : > { %v553_v23 = vld.sshfl [vmem:[#allocation1 + $0x18] sm:$0xff pattern:$0x73625140]  ;;  %v547_v24 = vld.sshfl [vmem:[#allocation1] sm:$0xff pattern:$0x73625140] }
  0x45   : > { %625 = vst [vmem:[#allocation1] ss:$4 sm:$0xff] %v1042_v0 }
  0x4a   : > { %555 = vrot.lane.b32.xlu1 %v547_v24, %s1003_s22 }
  0x4b   : > { %476 = vrot.lane.b32.xlu2 %v468_v18, %s1002_s21  ;;  %s971_s21 = smul.u32 24, %s1172_s13 }
  0x4c   : > { %v632_v25 = vld.sshfl [vmem:[#allocation1 + $0x18] sm:$0xff pattern:$0x73625140]  ;;  %v626_v26 = vld.sshfl [vmem:[#allocation1] sm:$0xff pattern:$0x73625140] }
  0x4d   : > { %634 = vrot.lane.b32.xlu0 %v626_v26, %s1004_s23  ;;  %v628_v27 = vld.sshfl [vmem:[#allocation1 + $0x8] sm:$0xff pattern:$0x73625140]  ;;  %v630_v28 = vld.sshfl [vmem:[#allocation1 + $0x10] sm:$0xff pattern:$0x73625140] }
  0x4e   : > { %704 = vst [vmem:[#allocation1] ss:$4 sm:$0xff] %v1042_v0 }
  0x52   : > { %636 = vrot.lane.b32.xlu1 %v628_v27, %s1004_s23 }
  0x53   : > { %557 = vrot.lane.b32.xlu2 %v549_v21, %s1003_s22 }
  0x55   : > { %561 = vrot.lane.b32.xlu0 %v553_v23, %s1003_s22  ;;  %v705_v29 = vld.sshfl [vmem:[#allocation1] sm:$0xff pattern:$0x73625140]  ;;  %v707_v30 = vld.sshfl [vmem:[#allocation1 + $0x8] sm:$0xff pattern:$0x73625140] }
  0x56   : > { %v709_v31 = vld.sshfl [vmem:[#allocation1 + $0x10] sm:$0xff pattern:$0x73625140]  ;;  %v711_v32 = vld.sshfl [vmem:[#allocation1 + $0x18] sm:$0xff pattern:$0x73625140] }
  0x57   : > { %783 = vst [vmem:[#allocation1] ss:$4 sm:$0xff] %v1042_v0 }
  0x5a   : > { %638 = vrot.lane.b32.xlu1 %v630_v28, %s1004_s23 }
  0x5b   : > { %559 = vrot.lane.b32.xlu2 %v551_v22, %s1003_s22 }
  0x5d   : > { %717 = vrot.lane.b32.xlu0 %v709_v31, %s1005_s24 }
  0x5e   : > { %v788_v33 = vld.sshfl [vmem:[#allocation1 + $0x10] sm:$0xff pattern:$0x73625140]  ;;  %v784_v34 = vld.sshfl [vmem:[#allocation1] sm:$0xff pattern:$0x73625140] }
  0x5f   : > { %v786_v36 = vld.sshfl [vmem:[#allocation1 + $0x8] sm:$0xff pattern:$0x73625140]  ;;  %v790_v37 = vld.sshfl [vmem:[#allocation1 + $0x18] sm:$0xff pattern:$0x73625140] }
  0x62   : > { %640 = vrot.lane.b32.xlu1 %v632_v25, %s1004_s23 }
  0x63   : > { %715 = vrot.lane.b32.xlu2 %v707_v30, %s1005_s24 }
  0x65   : > { %719 = vrot.lane.b32.xlu0 %v711_v32, %s1005_s24  ;;  %v948_v32 = vld [vmem:[%s1168_s1 + $0x10] sm:$0xf] }
  0x6a   : > { %796 = vrot.lane.b32.xlu1 %v788_v33, %s1006_s25 }
  0x6b   : > { %713 = vrot.lane.b32.xlu2 %v705_v29, %s1005_s24  ;;  %v952_v29 = vld [vmem:[%s1168_s1 + $0x14] sm:$0xf]  ;;  %s170_s24 = scalar_lea.vmem %s1170_s3, %s971_s21 }
  0x6d   : > { %792 = vrot.lane.b32.xlu0 %v784_v34, %s1006_s25 }
  0x72   : > { %794 = vrot.lane.b32.xlu1 %v786_v36, %s1006_s25 }
  0x73   : > { %798 = vrot.lane.b32.xlu2 %v790_v37, %s1006_s25 }
  0x84   : > { %v319_v39 = vpop.permute.xlu2 %318 }
  0x89   : > { %v192_v40 = vpop.permute.xlu0 %191  ;;  %v188_v41 = vpop.permute.xlu1 %187 }
  0x8d   : > { %v321_v42 = vpop.permute.xlu2 %320 }
  0x8e   : > { %v327_v43 = vsel %vm326_vm2, %v319_v39, %v321_v42 }
  0x8f   : > { %v334_v54 = vsel %vm203_vm0, %v327_v43, 0 }
  0x91   : > { %v194_v44 = vpop.permute.xlu0 %193  ;;  %v190_v45 = vpop.permute.xlu1 %189 }
  0x92   : > { %v196_v47 = vsel %vm195_vm3, %v188_v41, %v190_v45  ;;  %v197_v48 = vsel %vm195_vm3, %v190_v45, %v192_v40  ;;  %v198_v49 = vsel %vm195_vm3, %v192_v40, %v194_v44  ;;  %v956_v44 = vld [vmem:[%s1168_s1 + $0x18] sm:$0xf] }
  0x93   : > { %v205_v51 = vsel %vm203_vm0, %v196_v47, 0  ;;  %v208_v52 = vsel %vm203_vm0, %v197_v48, 0  ;;  %v211_v53 = vsel %vm203_vm0, %v198_v49, 0 }
  0x94   : > { %220 = vmatpush.bf16.msra.mxu0 %v205_v51  ;;  %233 = vmatpush.bf16.msra.mxu1 %v208_v52 }
  0x95   : > { %246 = vmatpush.bf16.msra.mxu2 %v211_v53  ;;  %v402_v56 = vpop.permute.xlu2 %401 }
  0x97   : > { %934 = vmatmul.msk.bf16.vlgmr.msra.gmra.mxu0 %vm199_vm1, %v933_v55  ;;  %935 = vmatmul.msk.bf16.vlgmr.msra.gmra.mxu1 %vm199_vm1, %v933_v55 }
  0x98   : > { %286 = vmatpush.bf16.msrb.mxu0 %v262_v46  ;;  %299 = vmatpush.bf16.msrb.mxu1 %v264_v50 }
  0x99   : > { %349 = vmatpush.bf16.msrb.mxu2 %v334_v54 }
  0x9a   : > { %936 = vmatmul.msk.bf16.vlgmr.msra.gmra.mxu2 %vm199_vm1, %v933_v55 }
  0x9c   : > { %v323_v57 = vpop.permute.xlu0 %322 }
  0x9d   : > { %v328_v58 = vsel %vm326_vm2, %v321_v42, %v323_v57  ;;  %v404_v59 = vpop.permute.xlu2 %403 }
  0x9e   : > { %v337_v60 = vsel %vm203_vm0, %v328_v58, 0  ;;  %v408_v61 = vsel %vm405_vm4, %v402_v56, %v404_v59 }
  0x9f   : > { %362 = vmatpush.bf16.msrb.mxu3 %v337_v60  ;;  %v419_v63 = vsel %vm203_vm0, %v408_v61, 0 }
  0xa2   : > { %942 = vmatmul.msk.bf16.vlgmr.msrb.gmra.mxu3 %vm199_vm1, %v940_v62 }
  0xa3   : > { %454 = vmatpush.bf16.msra.mxu3 %v419_v63 }
  0xa4   : > { %v400_v0 = vpop.permute.xlu1 %399  ;;  %v325_v1 = vpop.permute.xlu0 %324 }
  0xa5   : > { %v407_v2 = vsel %vm405_vm4, %v400_v0, %v402_v56  ;;  %v329_v3 = vsel %vm326_vm2, %v323_v57, %v325_v1  ;;  %v477_v4 = vpop.permute.xlu2 %476  ;;  %v960_v57 = vld [vmem:[%s1168_s1 + $0x1c] sm:$0xf] }
  0xa6   : > { %v416_v5 = vsel %vm203_vm0, %v407_v2, 0  ;;  %v340_v6 = vsel %vm203_vm0, %v329_v3, 0  ;;  %v1007_v2 = vmov 0   ;;  %v858_v3 = vld [vmem:[%s1169_s2] sm:$0xff] }
  0xa7   : > { %375 = vmatpush.bf16.msra.mxu0 %v340_v6  ;;  %441 = vmatpush.bf16.msra.mxu2 %v416_v5  ;;  %v275_v1 = vpop.f32.mrf.mxu3 }
  0xa8   : > { %938 = vmatmul.msk.bf16.vlgmr.msrb.gmra.mxu0 %vm199_vm1, %v173_v38  ;;  %939 = vmatmul.msk.bf16.vlgmr.msrb.gmra.mxu1 %vm199_vm1, %v173_v38 }
  0xa9   : > { %989 = vset.pattern.permute.xlu2 %v1007_v2  ;;  %990 = vset.pattern.permute.xlu0 %v1007_v2 }
  0xaa   : > { %941 = vmatmul.msk.bf16.vlgmr.msrb.gmra.mxu2 %vm199_vm1, %v940_v62  ;;  %861 = vperm.xlu2 %989, %v858_v3  }
  0xac   : > { %v398_v7 = vpop.permute.xlu1 %397 }
  0xad   : > { %v406_v8 = vsel %vm405_vm4, %v398_v7, %v400_v0  ;;  %v481_v9 = vpop.permute.xlu0 %480  ;;  %v558_v10 = vpop.permute.xlu2 %557  ;;  %v964_v0 = vld [vmem:[%s1168_s1 + $0x20] sm:$0xf] }
  0xae   : > { %v413_v11 = vsel %vm203_vm0, %v406_v8, 0 }
  0xaf   : > { %428 = vmatpush.bf16.msra.mxu1 %v413_v11 }
  0xb2   : > { %947 = vmatmul.msk.bf16.vlgmr.msra.gmra.mxu3 %vm199_vm1, %v944_v12 }
  0xb4   : > { %v483_v13 = vpop.permute.xlu1 %482 }
  0xb5   : > { %v487_v14 = vsel %vm484_vm5, %v481_v9, %v483_v13  ;;  %v479_v15 = vpop.permute.xlu0 %478  ;;  %v560_v16 = vpop.permute.xlu2 %559 }
  0xb6   : > { %v498_v17 = vsel %vm203_vm0, %v487_v14, 0  ;;  %v486_v18 = vsel %vm484_vm5, %v479_v15, %v481_v9  ;;  %v485_v19 = vsel %vm484_vm5, %v477_v4, %v479_v15  ;;  %v565_v20 = vsel %vm563_vm6, %v558_v10, %v560_v16  ;;  %v277_v4 = vpop.f32.mrf.mxu3 }
  0xb7   : > { %v495_v21 = vsel %vm203_vm0, %v486_v18, 0  ;;  %v492_v22 = vsel %vm203_vm0, %v485_v19, 0  ;;  %533 = vmatpush.bf16.msrb.mxu2 %v498_v17  ;;  %v574_v23 = vsel %vm203_vm0, %v565_v20, 0 }
  0xb8   : > { %520 = vmatpush.bf16.msrb.mxu1 %v495_v21  ;;  %943 = vmatmul.msk.bf16.vlgmr.msra.gmra.mxu0 %vm199_vm1, %v940_v62 }
  0xb9   : > { %945 = vmatmul.msk.bf16.vlgmr.msra.gmra.mxu1 %vm199_vm1, %v944_v12  ;;  %507 = vmatpush.bf16.msrb.mxu0 %v492_v22 }
  0xba   : > { %946 = vmatmul.msk.bf16.vlgmr.msra.gmra.mxu2 %vm199_vm1, %v944_v12 }
  0xbc   : > { %v556_v24 = vpop.permute.xlu1 %555 }
  0xbd   : > { %599 = vmatpush.bf16.msra.mxu0 %v574_v23  ;;  %v564_v25 = vsel %vm563_vm6, %v556_v24, %v558_v10  ;;  %v716_v26 = vpop.permute.xlu2 %715 }
  0xbe   : > { %v571_v27 = vsel %vm203_vm0, %v564_v25, 0 }
  0xbf   : > { %v635_v28 = vpop.permute.xlu0 %634  ;;  %586 = vmatpush.bf16.msrb.mxu3 %v571_v27 }
  0xc2   : > { %953 = vmatmul.msk.bf16.vlgmr.msrb.gmra.mxu3 %vm199_vm1, %v952_v29 }
  0xc4   : > { %v637_v30 = vpop.permute.xlu1 %636 }
  0xc5   : > { %v643_v31 = vsel %vm642_vm7, %v635_v28, %v637_v30  ;;  %v714_v33 = vpop.permute.xlu2 %713 }
  0xc6   : > { %v650_v34 = vsel %vm203_vm0, %v643_v31, 0  ;;  %v722_v35 = vsel %vm721_vm8, %v714_v33, %v716_v26 }
  0xc7   : > { %v562_v36 = vpop.permute.xlu0 %561  ;;  %665 = vmatpush.bf16.msra.mxu2 %v650_v34  ;;  %v729_v38 = vsel %vm203_vm0, %v722_v35, 0 }
  0xc8   : > { %v566_v37 = vsel %vm563_vm6, %v560_v16, %v562_v36  ;;  %949 = vmatmul.msk.bf16.vlgmr.msrb.gmra.mxu0 %vm199_vm1, %v948_v32 }
  0xc9   : > { %v577_v39 = vsel %vm203_vm0, %v566_v37, 0  ;;  %950 = vmatmul.msk.bf16.vlgmr.msrb.gmra.mxu1 %vm199_vm1, %v948_v32 }
  0xca   : > { %951 = vmatmul.msk.bf16.vlgmr.msrb.gmra.mxu2 %vm199_vm1, %v948_v32  ;;  %612 = vmatpush.bf16.msra.mxu1 %v577_v39 }
  0xcc   : > { %v639_v40 = vpop.permute.xlu1 %638 }
  0xcd   : > { %v644_v41 = vsel %vm642_vm7, %v637_v30, %v639_v40  ;;  %v799_v53 = vpop.permute.xlu2 %798 }
  0xce   : > { %744 = vmatpush.bf16.msrb.mxu1 %v729_v38  ;;  %v653_v42 = vsel %vm203_vm0, %v644_v41, 0 }
  0xcf   : > { %v718_v43 = vpop.permute.xlu0 %717  ;;  %678 = vmatpush.bf16.msra.mxu3 %v653_v42 }
  0xd0   : > { %v723_v45 = vsel %vm721_vm8, %v716_v26, %v718_v43 }
  0xd1   : > { %v732_v46 = vsel %vm203_vm0, %v723_v45, 0 }
  0xd2   : > { %958 = vmatmul.msk.bf16.vlgmr.msra.gmra.mxu3 %vm199_vm1, %v956_v44  ;;  %757 = vmatpush.bf16.msrb.mxu2 %v732_v46 }
  0xd4   : > { %v641_v47 = vpop.permute.xlu1 %640 }
  0xd5   : > { %v645_v48 = vsel %vm642_vm7, %v639_v40, %v641_v47 }
  0xd6   : > { %v656_v49 = vsel %vm203_vm0, %v645_v48, 0 }
  0xd7   : > { %v720_v50 = vpop.permute.xlu0 %719  ;;  %691 = vmatpush.bf16.msrb.mxu0 %v656_v49 }
  0xd8   : > { %v724_v51 = vsel %vm721_vm8, %v718_v43, %v720_v50  ;;  %954 = vmatmul.msk.bf16.vlgmr.msra.gmra.mxu0 %vm199_vm1, %v952_v29 }
  0xd9   : > { %v735_v52 = vsel %vm203_vm0, %v724_v51, 0  ;;  %955 = vmatmul.msk.bf16.vlgmr.msra.gmra.mxu1 %vm199_vm1, %v952_v29 }
  0xda   : > { %957 = vmatmul.msk.bf16.vlgmr.msra.gmra.mxu2 %vm199_vm1, %v956_v44  ;;  %770 = vmatpush.bf16.msrb.mxu3 %v735_v52 }
  0xdc   : > { %v797_v54 = vpop.permute.xlu1 %796 }
  0xdd   : > { %v803_v55 = vsel %vm800_vm9, %v797_v54, %v799_v53 }
  0xde   : > { %v814_v56 = vsel %vm203_vm0, %v803_v55, 0 }
  0xdf   : > { %849 = vmatpush.bf16.msra.mxu2 %v814_v56  ;;  %v793_v58 = vpop.permute.xlu0 %792 }
  0xe2   : > { %963 = vmatmul.msk.bf16.vlgmr.msrb.gmra.mxu3 %vm199_vm1, %v960_v57 }
  0xe4   : > { %v795_v59 = vpop.permute.xlu1 %794 }
  0xe5   : > { %v802_v60 = vsel %vm800_vm9, %v795_v59, %v797_v54  ;;  %v801_v61 = vsel %vm800_vm9, %v793_v58, %v795_v59 }
  0xe6   : > { %v811_v62 = vsel %vm203_vm0, %v802_v60, 0  ;;  %v808_v63 = vsel %vm203_vm0, %v801_v61, 0 }
  0xe7   : > { %836 = vmatpush.bf16.msra.mxu1 %v811_v62  ;;  %823 = vmatpush.bf16.msra.mxu0 %v808_v63 }
  0xe8   : > { %959 = vmatmul.msk.bf16.vlgmr.msrb.gmra.mxu0 %vm199_vm1, %v956_v44 }
  0xe9   : > { %961 = vmatmul.msk.bf16.vlgmr.msrb.gmra.mxu1 %vm199_vm1, %v960_v57 }
  0xea   : > { %962 = vmatmul.msk.bf16.vlgmr.msrb.gmra.mxu2 %vm199_vm1, %v960_v57 }
  0xf8   : > { %965 = vmatmul.msk.bf16.vlgmr.msra.gmra.mxu0 %vm199_vm1, %v964_v0 }
  0xf9   : > { %966 = vmatmul.msk.bf16.vlgmr.msra.gmra.mxu1 %vm199_vm1, %v964_v0 }
  0xfa   : > { %967 = vmatmul.msk.bf16.vlgmr.msra.gmra.mxu2 %vm199_vm1, %v964_v0 }
 0x114   : > { %v222_v5 = vpop.f32.mrf.mxu0  ;;  %v235_v6 = vpop.f32.mrf.mxu1 }
 0x115   : > { %v276_v7 = vadd.f32 %v275_v1, %v222_v5 }
 0x11c   : > { %v224_v9 = vpop.f32.mrf.mxu0  ;;  %v237_v10 = vpop.f32.mrf.mxu1 }
 0x11d   : > { %v248_v8 = vpop.f32.mrf.mxu2 }
 0x125   : > { %v250_v11 = vpop.f32.mrf.mxu2  ;;  %v288_v12 = vpop.f32.mrf.mxu0 }
 0x126   : > { %v301_v13 = vpop.f32.mrf.mxu1  ;;  %v289_v14 = vadd.f32 %v288_v12, %v235_v6  ;;  %v364_v16 = vpop.f32.mrf.mxu3 }
 0x127   : > { %v302_v15 = vadd.f32 %v301_v13, %v248_v8 }
 0x128   : > { %v382_v17 = vadd.f32 %v364_v16, %v289_v14 }
 0x12d   : > { %v351_v18 = vpop.f32.mrf.mxu2  ;;  %v290_v19 = vpop.f32.mrf.mxu0 }
 0x12e   : > { %v303_v20 = vpop.f32.mrf.mxu1  ;;  %v366_v21 = vpop.f32.mrf.mxu3  ;;  %v381_v50 = vadd.f32 %v351_v18, %v276_v7 }
 0x12f   : > { %v862_v7 = vpop.permute.xlu2 %861 }
 0x135   : > { %v353_v22 = vpop.f32.mrf.mxu2  ;;  %v377_v23 = vpop.f32.mrf.mxu0 }
 0x136   : > { %v430_v24 = vpop.f32.mrf.mxu1  ;;  %v456_v25 = vpop.f32.mrf.mxu3  ;;  %v383_v55 = vadd.f32 %v377_v23, %v302_v15 }
 0x137   : > { %v460_v51 = vadd.f32 %v430_v24, %v381_v50 }
 0x138   : > { %v462_v62 = vadd.f32 %v456_v25, %v383_v55 }
 0x13d   : > { %v443_v26 = vpop.f32.mrf.mxu2  ;;  %v379_v27 = vpop.f32.mrf.mxu0 }
 0x13e   : > { %v432_v28 = vpop.f32.mrf.mxu1  ;;  %v458_v29 = vpop.f32.mrf.mxu3  ;;  %v461_v52 = vadd.f32 %v443_v26, %v382_v17 }
 0x145   : > { %v445_v30 = vpop.f32.mrf.mxu2  ;;  %v509_v31 = vpop.f32.mrf.mxu0 }
 0x146   : > { %v522_v32 = vpop.f32.mrf.mxu1  ;;  %v588_v33 = vpop.f32.mrf.mxu3  ;;  %v539_v53 = vadd.f32 %v509_v31, %v460_v51 }
 0x147   : > { %v540_v56 = vadd.f32 %v522_v32, %v461_v52 }
 0x148   : > { %v618_v61 = vadd.f32 %v588_v33, %v539_v53 }
 0x14d   : > { %v535_v34 = vpop.f32.mrf.mxu2  ;;  %v511_v35 = vpop.f32.mrf.mxu0 }
 0x14e   : > { %v524_v36 = vpop.f32.mrf.mxu1  ;;  %v590_v37 = vpop.f32.mrf.mxu3  ;;  %v541_v0 = vadd.f32 %v535_v34, %v462_v62 }
 0x155   : > { %v537_v38 = vpop.f32.mrf.mxu2  ;;  %v601_v39 = vpop.f32.mrf.mxu0 }
 0x156   : > { %v614_v40 = vpop.f32.mrf.mxu1  ;;  %v680_v41 = vpop.f32.mrf.mxu3  ;;  %v619_v60 = vadd.f32 %v601_v39, %v540_v56 }
 0x157   : > { %v620_v4 = vadd.f32 %v614_v40, %v541_v0 }
 0x158   : > { %v698_v1 = vadd.f32 %v680_v41, %v619_v60 }
 0x15d   : > { %v667_v42 = vpop.f32.mrf.mxu2  ;;  %v603_v43 = vpop.f32.mrf.mxu0 }
 0x15e   : > { %v616_v44 = vpop.f32.mrf.mxu1  ;;  %v682_v45 = vpop.f32.mrf.mxu3  ;;  %v697_v63 = vadd.f32 %v667_v42, %v618_v61 }
 0x165   : > { %v669_v46 = vpop.f32.mrf.mxu2  ;;  %v693_v47 = vpop.f32.mrf.mxu0 }
 0x166   : > { %v746_v48 = vpop.f32.mrf.mxu1  ;;  %v772_v49 = vpop.f32.mrf.mxu3  ;;  %v699_v10 = vadd.f32 %v693_v47, %v620_v4 }
 0x167   : > { %v776_v2 = vadd.f32 %v746_v48, %v697_v63 }
 0x168   : > { %v778_v14 = vadd.f32 %v772_v49, %v699_v10 }
 0x16d   : > { %v759_v54 = vpop.f32.mrf.mxu2  ;;  %v695_v57 = vpop.f32.mrf.mxu0 }
 0x16e   : > { %v748_v58 = vpop.f32.mrf.mxu1  ;;  %v774_v59 = vpop.f32.mrf.mxu3  ;;  %v777_v5 = vadd.f32 %v759_v54, %v698_v1 }
 0x175   : > { %v761_v3 = vpop.f32.mrf.mxu2  ;;  %v825_v6 = vpop.f32.mrf.mxu0 }
 0x176   : > { %v855_v8 = vadd.f32 %v825_v6, %v776_v2  ;;  %v838_v9 = vpop.f32.mrf.mxu1 }
 0x177   : > { %v856_v11 = vadd.f32 %v838_v9, %v777_v5 }
 0x178   : > { %v864_v12 = vadd.f32 %v862_v7, %v855_v8 }
 0x179   : > { %v865_v13 = vadd.f32 %v862_v7, %v856_v11 }
 0x17a   : > { %867 = vst [vmem:[%s170_s24] sm:$0xff] %v864_v12 }
 0x17b   : > { %868 = vst [vmem:[%s170_s24 + $0x8] sm:$0xff] %v865_v13 }
 0x17d   : > { %v851_v15 = vpop.f32.mrf.mxu2  ;;  %v827_v17 = vpop.f32.mrf.mxu0 }
 0x17e   : > { %v857_v16 = vadd.f32 %v851_v15, %v778_v14  ;;  %v840_v18 = vpop.f32.mrf.mxu1 }
 0x180   : > { %v866_v19 = vadd.f32 %v862_v7, %v857_v16 }
 0x182   : > { %869 = vst [vmem:[%s170_s24 + $0x10] sm:$0xff] %v866_v19 }
 0x185   : > { %v853_v20 = vpop.f32.mrf.mxu2 }
 0x186 PF: > { %s13_s12 = sadd.s32 1, %s997_s12  }
 0x187   : > { %p10_p4 = scmp.ge.s32.totalorder %s13_s12, 4  }
 0x189   :  { %12 = sbr.rel (!%p10_p4) target bundleno = 1 (0x1), region = 70 }

</bundles_post_ra>
